<compile_context>
chip_gen: v5e
topology: v5e:2x2
jax: 0.10.0
libtpu: 0.0.40
codegen_flags: <defaults>
</compile_context>

<pallas_src>
import functools

import jax
import jax.numpy as jnp
from jax import lax
from jax.experimental import pallas as pl
from jax.experimental.pallas import tpu as pltpu

KH = KW = 3  # kernel_size=3, stride=1, padding=0 (valid)


def _round_up(x, m):
    return ((x + m - 1) // m) * m


def _tpu_info():
    """Best-effort (VMEM capacity bytes, TensorCore count) with safe fallbacks."""
    vmem_cap = 64 << 20   # conservative default: v7x per-TC VMEM
    num_cores = 2         # assume a 2-TC chip unless proven otherwise (cheap if wrong)
    try:
        info = pltpu.get_tpu_info()
        cap = getattr(info, "vmem_capacity_bytes", None)
        if cap:
            vmem_cap = int(cap)
        for name in ("num_cores", "core_count", "num_tensorcores", "tensorcore_count"):
            val = getattr(info, name, None)
            if val:
                num_cores = int(val)
                break
    except Exception:
        pass
    return vmem_cap, num_cores


def _select_blocks(N, C, HW, W, elem, vmem_budget, num_cores):
    """Pick (nb, ct) so 2x input + 2x output + 2x f32 scratch fit the VMEM budget."""
    HWo = _round_up(HW, 128)                                   # lane-dense output width
    SW = HWo + _round_up((KH - 1) * W + (KW - 1), 128)         # scratch width (conv halo)
    sub = 8 * (4 // max(1, elem))                              # sublane tile: 8/16/32

    def footprint(nb, ct):
        ct_pad = _round_up(max(ct, 1), sub)
        inp = 2 * nb * ct_pad * HWo * elem                     # double-buffered input
        out = 2 * nb * sub * HWo * elem                        # double-buffered output
        scr = 2 * _round_up(nb, 8) * SW * 4                    # f32 running max/sum
        return inp + out + scr

    # Guarantee >= 2 batch blocks when there are >= 2 TensorCores to shard across (v7x);
    # on 1-TC chips fold the whole batch into one block.
    if N >= 2 and num_cores >= 2:
        nb = max(1, -(-N // 2))
    else:
        nb = N
    while nb > 1 and footprint(nb, C) > vmem_budget:
        nb = max(1, nb // 2)

    if footprint(nb, C) <= vmem_budget:
        ct = C                                                 # whole reduction, 1 C-step
    else:
        # nb == 1 and full C still does not fit: largest sublane-aligned channel tile.
        fixed = 2 * sub * HWo * elem + 2 * 8 * SW * 4
        per_ch = 2 * HWo * elem
        avail = max(vmem_budget - fixed, per_ch * sub)
        ct = max(sub, (avail // per_ch // sub) * sub)
        ct = min(ct, C)
    return nb, ct, HWo, SW


def _spatial_attention_kernel(params_ref, x_ref, o_ref, max_ref, sum_ref, *,
                              HW, W, C, ragged_c):
    # params_ref: SMEM f32[19]
    #   [0:9]   3x3 taps for the channel-max  plane (BN scale folded in)
    #   [9:18]  3x3 taps for the channel-mean plane (BN scale AND 1/C folded in)
    #   [18]    folded shift (BN beta + scale*(conv_bias - running_mean))
    c_step = pl.program_id(1)
    nb, ct, _ = x_ref.shape
    SW = max_ref.shape[-1]
    HWo = o_ref.shape[-1]

    # Dense block load + sublane-axis reductions: one pass over the slab feeds both the
    # running max and the running f32 sum (no per-channel extraction / relayout).
    blk = x_ref[...].astype(jnp.float32)                       # (nb, ct, HW)
    if ragged_c:
        valid = lax.broadcasted_iota(jnp.int32, blk.shape, 1) < (C - c_step * ct)
        blk_for_max = jnp.where(valid, blk, -jnp.inf)
        blk_for_sum = jnp.where(valid, blk, 0.0)
    else:
        blk_for_max = blk
        blk_for_sum = blk
    blk_max = jnp.max(blk_for_max, axis=1)                     # (nb, HW)
    blk_sum = jnp.sum(blk_for_sum, axis=1)                     # (nb, HW) f32

    @pl.when(c_step == 0)
    def _first():
        # Direct first write (no -inf init) and a zeroed conv halo so the finalize tap
        # slices only ever see finite data.
        max_ref[:, :HW] = blk_max
        sum_ref[:, :HW] = blk_sum
        max_ref[:, HW:] = jnp.zeros((nb, SW - HW), jnp.float32)
        sum_ref[:, HW:] = jnp.zeros((nb, SW - HW), jnp.float32)

    @pl.when(c_step > 0)
    def _accumulate():
        max_ref[:, :HW] = jnp.maximum(max_ref[:, :HW], blk_max)
        sum_ref[:, :HW] = sum_ref[:, :HW] + blk_sum

    @pl.when(c_step == pl.num_programs(1) - 1)
    def _finalize():
        # Hoist scalar params out of the tap loop (one SMEM read each).
        w_max = [params_ref[k] for k in range(KH * KW)]
        w_mean = [params_ref[KH * KW + k] for k in range(KH * KW)]
        shift = params_ref[2 * KH * KW]

        # 3x3 valid conv on the flat layout: output flat position p (= i*W + j) needs
        # input flat position p + kh*W + kw.  Taps are statically-shifted REF slices so
        # the lane shift folds into the load instead of relayouting a live (nb, SW)
        # value 18 times.  Garbage only lands at i >= H-2 or j >= W-2 (discarded).
        acc = jnp.zeros((nb, HWo), jnp.float32)
        for kh in range(KH):
            for kw in range(KW):
                sh = kh * W + kw
                acc = acc + w_max[kh * KW + kw] * max_ref[:, sh:sh + HWo]
                acc = acc + w_mean[kh * KW + kw] * sum_ref[:, sh:sh + HWo]

        y = jnp.maximum(acc + shift, 0.0)                       # conv bias + BN + ReLU
        o_ref[:, 0, :] = jax.nn.sigmoid(y).astype(o_ref.dtype)  # lane-dense full store


def spatial_attention(x, conv_w, conv_b, bn_gamma, bn_beta, bn_mean, bn_var, eps=1e-5):
    N, C, H, W = x.shape
    Ho, Wo = H - KH + 1, W - KW + 1
    HW = H * W
    elem = x.dtype.itemsize

    vmem_cap, num_cores = _tpu_info()
    vmem_limit = max(32 << 20, min(vmem_cap * 3 // 4, 64 << 20))   # ~48 MiB on 64-MiB VMEM
    vmem_budget = vmem_limit - (4 << 20)                           # headroom for internals

    nb, ct, HWo, SW = _select_blocks(N, C, HW, W, elem, vmem_budget, num_cores)
    grid = (pl.cdiv(N, nb), pl.cdiv(C, ct))
    ragged_c = (C % ct) != 0

    # Fold conv bias + inference-mode BatchNorm + the 1/C of the channel mean into the
    # taps/shift so the kernel epilogue is pure multiply-add on the raw running sum.
    scale = (bn_gamma / jnp.sqrt(bn_var + eps)).astype(jnp.float32)          # (1,)
    shift = (bn_beta + scale * (conv_b - bn_mean)).astype(jnp.float32)       # (1,)
    w = conv_w.astype(jnp.float32).reshape(2, KH * KW)                       # [max; mean]
    params = jnp.concatenate([w[0] * scale, w[1] * scale / C, shift])        # (19,)

    # Lane-dense flat spatial axis; the HBM input stays at HW (block last dim == full
    # array dim is legal), so no wrapper-side pad copy is needed when HW % 128 != 0.
    x_flat = x.reshape(N, C, HW)

    kernel = functools.partial(_spatial_attention_kernel,
                               HW=HW, W=W, C=C, ragged_c=ragged_c)

    cost = pl.CostEstimate(
        flops=2 * N * C * HW + 40 * N * HW,
        transcendentals=N * HW,
        bytes_accessed=N * C * HW * elem + N * HWo * elem + 19 * 4,
    )

    out_flat = pl.pallas_call(
        kernel,
        out_shape=jax.ShapeDtypeStruct((N, 1, HWo), x.dtype),
        grid=grid,
        in_specs=[
            pl.BlockSpec(memory_space=pltpu.MemorySpace.SMEM),        # 19 scalar params
            pl.BlockSpec((nb, ct, HW), lambda n, c: (n, c, 0)),       # lane-dense input
        ],
        out_specs=pl.BlockSpec((nb, 1, HWo), lambda n, c: (n, 0, 0)),  # dense output
        scratch_shapes=[
            pltpu.VMEM((nb, SW), jnp.float32),   # running channel max (+ zeroed halo)
            pltpu.VMEM((nb, SW), jnp.float32),   # running channel sum (f32)
        ],
        compiler_params=pltpu.CompilerParams(
            dimension_semantics=("parallel", "arbitrary"),  # batch parallel, C reduction
            vmem_limit_bytes=int(vmem_limit),
        ),
        cost_estimate=cost,
    )(params, x_flat)

    # Output is in input-flat layout (garbage at i>=Ho or j>=Wo and in the lane pad);
    # slice the valid region back out on the XLA side.
    return out_flat[:, :, :HW].reshape(N, 1, H, W)[:, :, :Ho, :Wo]


def _reference(x, conv_w, conv_b, bn_gamma, bn_beta, bn_mean, bn_var, eps=1e-5):
    ch_max = jnp.max(x, axis=1, keepdims=True)
    ch_mean = jnp.mean(x, axis=1, keepdims=True)
    pooled = jnp.concatenate([ch_max, ch_mean], axis=1)          # (N, 2, H, W)
    conv = lax.conv_general_dilated(
        pooled, conv_w, window_strides=(1, 1), padding="VALID",
        dimension_numbers=("NCHW", "OIHW", "NCHW"))
    conv = conv + conv_b.reshape(1, -1, 1, 1)
    bn = (conv - bn_mean.reshape(1, -1, 1, 1)) / jnp.sqrt(bn_var.reshape(1, -1, 1, 1) + eps)
    bn = bn * bn_gamma.reshape(1, -1, 1, 1) + bn_beta.reshape(1, -1, 1, 1)
    return jax.nn.sigmoid(jnp.maximum(bn, 0.0))


if __name__ == "__main__":
    key = jax.random.PRNGKey(0)
    kx, kw, kb = jax.random.split(key, 3)

    N, C, H, W = 2, 4, 16, 16
    x = jax.random.normal(kx, (N, C, H, W), dtype=jnp.float32)

    # Deterministic synthetic parameters (shapes from SpatialAttention.__init__).
    conv_w = 0.2 * jax.random.normal(kw, (1, 2, KH, KW), dtype=jnp.float32)  # OIHW
    conv_b = 0.1 * jax.random.normal(kb, (1,), dtype=jnp.float32)
    bn_gamma = jnp.array([1.2], dtype=jnp.float32)
    bn_beta = jnp.array([0.1], dtype=jnp.float32)
    bn_mean = jnp.array([0.05], dtype=jnp.float32)
    bn_var = jnp.array([0.9], dtype=jnp.float32)

    out = spatial_attention(x, conv_w, conv_b, bn_gamma, bn_beta, bn_mean, bn_var)
    out = jax.block_until_ready(out)

    ref = _reference(x, conv_w, conv_b, bn_gamma, bn_beta, bn_mean, bn_var)
    assert out.shape == (N, 1, H - 2, W - 2), out.shape
    assert jnp.allclose(out, ref, atol=1e-5, rtol=1e-5), float(jnp.max(jnp.abs(out - ref)))

    print("KERNEL_OK")
</pallas_src>

<mosaic_0001>
module attributes {stable_mosaic.version = 11 : i64} {
  func.func @_spatial_attention_kernel(%arg0: i32, %arg1: i32, %arg2: memref<19xf32, #tpu.memory_space<smem>>, %arg3: memref<1x4x256xf32, #tpu.memory_space<vmem>>, %arg4: memref<1x1x256xf32, #tpu.memory_space<vmem>>, %arg5: memref<1x384xf32, #tpu.memory_space<vmem>>, %arg6: memref<1x384xf32, #tpu.memory_space<vmem>>) attributes {dimension_semantics = [#tpu.dimension_semantics<parallel>, #tpu.dimension_semantics<arbitrary>], iteration_bounds = array<i64: 2, 1>, scalar_prefetch = 0 : i64, scratch_operands = 2 : i64, tpu.core_type = #tpu.core_type<tc>, window_params = [{transform_indices = @transform_0, window_bounds = array<i64: 19>}, {transform_indices = @transform_1, window_bounds = array<i64: 1, 4, 256>}, {transform_indices = @transform_2, window_bounds = array<i64: 1, 1, 256>}]} {
    %c0 = arith.constant 0 : index
    %c0_0 = arith.constant 0 : index
    %c0_1 = arith.constant 0 : index
    %0 = vector.load %arg3[%c0, %c0_0, %c0_1] : memref<1x4x256xf32, #tpu.memory_space<vmem>>, vector<1x4x256xf32>
    %cst = arith.constant dense<0xFF800000> : vector<1x256xf32>
    %1 = vector.multi_reduction <maximumf>, %0, %cst [1] : vector<1x4x256xf32> to vector<1x256xf32>
    %cst_2 = arith.constant dense<0.000000e+00> : vector<1x256xf32>
    %2 = vector.multi_reduction <add>, %0, %cst_2 [1] : vector<1x4x256xf32> to vector<1x256xf32>
    %c0_i32 = arith.constant 0 : i32
    %3 = arith.cmpi eq, %arg1, %c0_i32 : i32
    %4 = arith.extui %3 : i1 to i32
    %c0_i32_3 = arith.constant 0 : i32
    %5 = arith.cmpi ne, %4, %c0_i32_3 : i32
    scf.if %5 {
      %c0_8 = arith.constant 0 : index
      %c0_9 = arith.constant 0 : index
      %12 = vector.load %arg5[%c0_8, %c0_9] : memref<1x384xf32, #tpu.memory_space<vmem>>, vector<1x256xf32>
      tpu.vector_store %arg5[%c0_8, %c0_9], %1 {strides = array<i32>} : memref<1x384xf32, #tpu.memory_space<vmem>>, vector<1x256xf32>,
      %c0_10 = arith.constant 0 : index
      %c0_11 = arith.constant 0 : index
      %13 = vector.load %arg6[%c0_10, %c0_11] : memref<1x384xf32, #tpu.memory_space<vmem>>, vector<1x256xf32>
      tpu.vector_store %arg6[%c0_10, %c0_11], %2 {strides = array<i32>} : memref<1x384xf32, #tpu.memory_space<vmem>>, vector<1x256xf32>,
      %cst_12 = arith.constant 0.000000e+00 : f32
      %14 = vector.broadcast %cst_12 : f32 to vector<1x128xf32>
      %c0_13 = arith.constant 0 : index
      %c256 = arith.constant 256 : index
      %15 = vector.load %arg5[%c0_13, %c256] : memref<1x384xf32, #tpu.memory_space<vmem>>, vector<1x128xf32>
      tpu.vector_store %arg5[%c0_13, %c256], %14 {strides = array<i32>} : memref<1x384xf32, #tpu.memory_space<vmem>>, vector<1x128xf32>,
      %cst_14 = arith.constant 0.000000e+00 : f32
      %16 = vector.broadcast %cst_14 : f32 to vector<1x128xf32>
      %c0_15 = arith.constant 0 : index
      %c256_16 = arith.constant 256 : index
      %17 = vector.load %arg6[%c0_15, %c256_16] : memref<1x384xf32, #tpu.memory_space<vmem>>, vector<1x128xf32>
      tpu.vector_store %arg6[%c0_15, %c256_16], %16 {strides = array<i32>} : memref<1x384xf32, #tpu.memory_space<vmem>>, vector<1x128xf32>,
    } else {
    }
    %c0_i32_4 = arith.constant 0 : i32
    %6 = arith.cmpi sgt, %arg1, %c0_i32_4 : i32
    %7 = arith.extui %6 : i1 to i32
    %c0_i32_5 = arith.constant 0 : i32
    %8 = arith.cmpi ne, %7, %c0_i32_5 : i32
    scf.if %8 {
      %c0_8 = arith.constant 0 : index
      %c0_9 = arith.constant 0 : index
      %12 = vector.load %arg5[%c0_8, %c0_9] : memref<1x384xf32, #tpu.memory_space<vmem>>, vector<1x256xf32>
      %13 = arith.maximumf %12, %1 : vector<1x256xf32>
      %c0_10 = arith.constant 0 : index
      %c0_11 = arith.constant 0 : index
      %14 = vector.load %arg5[%c0_10, %c0_11] : memref<1x384xf32, #tpu.memory_space<vmem>>, vector<1x256xf32>
      tpu.vector_store %arg5[%c0_10, %c0_11], %13 {strides = array<i32>} : memref<1x384xf32, #tpu.memory_space<vmem>>, vector<1x256xf32>,
      %c0_12 = arith.constant 0 : index
      %c0_13 = arith.constant 0 : index
      %15 = vector.load %arg6[%c0_12, %c0_13] : memref<1x384xf32, #tpu.memory_space<vmem>>, vector<1x256xf32>
      %16 = arith.addf %15, %2 : vector<1x256xf32>
      %c0_14 = arith.constant 0 : index
      %c0_15 = arith.constant 0 : index
      %17 = vector.load %arg6[%c0_14, %c0_15] : memref<1x384xf32, #tpu.memory_space<vmem>>, vector<1x256xf32>
      tpu.vector_store %arg6[%c0_14, %c0_15], %16 {strides = array<i32>} : memref<1x384xf32, #tpu.memory_space<vmem>>, vector<1x256xf32>,
    } else {
    }
    %c0_i32_6 = arith.constant 0 : i32
    %9 = arith.cmpi eq, %arg1, %c0_i32_6 : i32
    %10 = arith.extui %9 : i1 to i32
    %c0_i32_7 = arith.constant 0 : i32
    %11 = arith.cmpi ne, %10, %c0_i32_7 : i32
    scf.if %11 {
      %c0_8 = arith.constant 0 : index
      %12 = memref.load %arg2[%c0_8] : memref<19xf32, #tpu.memory_space<smem>>
      %c1 = arith.constant 1 : index
      %13 = memref.load %arg2[%c1] : memref<19xf32, #tpu.memory_space<smem>>
      %c2 = arith.constant 2 : index
      %14 = memref.load %arg2[%c2] : memref<19xf32, #tpu.memory_space<smem>>
      %c3 = arith.constant 3 : index
      %15 = memref.load %arg2[%c3] : memref<19xf32, #tpu.memory_space<smem>>
      %c4 = arith.constant 4 : index
      %16 = memref.load %arg2[%c4] : memref<19xf32, #tpu.memory_space<smem>>
      %c5 = arith.constant 5 : index
      %17 = memref.load %arg2[%c5] : memref<19xf32, #tpu.memory_space<smem>>
      %c6 = arith.constant 6 : index
      %18 = memref.load %arg2[%c6] : memref<19xf32, #tpu.memory_space<smem>>
      %c7 = arith.constant 7 : index
      %19 = memref.load %arg2[%c7] : memref<19xf32, #tpu.memory_space<smem>>
      %c8 = arith.constant 8 : index
      %20 = memref.load %arg2[%c8] : memref<19xf32, #tpu.memory_space<smem>>
      %c9 = arith.constant 9 : index
      %21 = memref.load %arg2[%c9] : memref<19xf32, #tpu.memory_space<smem>>
      %c10 = arith.constant 10 : index
      %22 = memref.load %arg2[%c10] : memref<19xf32, #tpu.memory_space<smem>>
      %c11 = arith.constant 11 : index
      %23 = memref.load %arg2[%c11] : memref<19xf32, #tpu.memory_space<smem>>
      %c12 = arith.constant 12 : index
      %24 = memref.load %arg2[%c12] : memref<19xf32, #tpu.memory_space<smem>>
      %c13 = arith.constant 13 : index
      %25 = memref.load %arg2[%c13] : memref<19xf32, #tpu.memory_space<smem>>
      %c14 = arith.constant 14 : index
      %26 = memref.load %arg2[%c14] : memref<19xf32, #tpu.memory_space<smem>>
      %c15 = arith.constant 15 : index
      %27 = memref.load %arg2[%c15] : memref<19xf32, #tpu.memory_space<smem>>
      %c16 = arith.constant 16 : index
      %28 = memref.load %arg2[%c16] : memref<19xf32, #tpu.memory_space<smem>>
      %c17 = arith.constant 17 : index
      %29 = memref.load %arg2[%c17] : memref<19xf32, #tpu.memory_space<smem>>
      %c18 = arith.constant 18 : index
      %30 = memref.load %arg2[%c18] : memref<19xf32, #tpu.memory_space<smem>>
      %cst_9 = arith.constant 0.000000e+00 : f32
      %31 = vector.broadcast %cst_9 : f32 to vector<1x256xf32>
      %c0_10 = arith.constant 0 : index
      %c0_11 = arith.constant 0 : index
      %32 = vector.load %arg5[%c0_10, %c0_11] : memref<1x384xf32, #tpu.memory_space<vmem>>, vector<1x256xf32>
      %33 = vector.broadcast %12 : f32 to vector<1x256xf32>
      %34 = arith.mulf %33, %32 : vector<1x256xf32>
      %35 = arith.addf %31, %34 : vector<1x256xf32>
      %c0_12 = arith.constant 0 : index
      %c0_13 = arith.constant 0 : index
      %36 = vector.load %arg6[%c0_12, %c0_13] : memref<1x384xf32, #tpu.memory_space<vmem>>, vector<1x256xf32>
      %37 = vector.broadcast %21 : f32 to vector<1x256xf32>
      %38 = arith.mulf %37, %36 : vector<1x256xf32>
      %39 = arith.addf %35, %38 : vector<1x256xf32>
      %c0_14 = arith.constant 0 : index
      %c1_15 = arith.constant 1 : index
      %40 = vector.load %arg5[%c0_14, %c1_15] : memref<1x384xf32, #tpu.memory_space<vmem>>, vector<1x256xf32>
      %41 = vector.broadcast %13 : f32 to vector<1x256xf32>
      %42 = arith.mulf %41, %40 : vector<1x256xf32>
      %43 = arith.addf %39, %42 : vector<1x256xf32>
      %c0_16 = arith.constant 0 : index
      %c1_17 = arith.constant 1 : index
      %44 = vector.load %arg6[%c0_16, %c1_17] : memref<1x384xf32, #tpu.memory_space<vmem>>, vector<1x256xf32>
      %45 = vector.broadcast %22 : f32 to vector<1x256xf32>
      %46 = arith.mulf %45, %44 : vector<1x256xf32>
      %47 = arith.addf %43, %46 : vector<1x256xf32>
      %c0_18 = arith.constant 0 : index
      %c2_19 = arith.constant 2 : index
      %48 = vector.load %arg5[%c0_18, %c2_19] : memref<1x384xf32, #tpu.memory_space<vmem>>, vector<1x256xf32>
      %49 = vector.broadcast %14 : f32 to vector<1x256xf32>
      %50 = arith.mulf %49, %48 : vector<1x256xf32>
      %51 = arith.addf %47, %50 : vector<1x256xf32>
      %c0_20 = arith.constant 0 : index
      %c2_21 = arith.constant 2 : index
      %52 = vector.load %arg6[%c0_20, %c2_21] : memref<1x384xf32, #tpu.memory_space<vmem>>, vector<1x256xf32>
      %53 = vector.broadcast %23 : f32 to vector<1x256xf32>
      %54 = arith.mulf %53, %52 : vector<1x256xf32>
      %55 = arith.addf %51, %54 : vector<1x256xf32>
      %c0_22 = arith.constant 0 : index
      %c16_23 = arith.constant 16 : index
      %56 = vector.load %arg5[%c0_22, %c16_23] : memref<1x384xf32, #tpu.memory_space<vmem>>, vector<1x256xf32>
      %57 = vector.broadcast %15 : f32 to vector<1x256xf32>
      %58 = arith.mulf %57, %56 : vector<1x256xf32>
      %59 = arith.addf %55, %58 : vector<1x256xf32>
      %c0_24 = arith.constant 0 : index
      %c16_25 = arith.constant 16 : index
      %60 = vector.load %arg6[%c0_24, %c16_25] : memref<1x384xf32, #tpu.memory_space<vmem>>, vector<1x256xf32>
      %61 = vector.broadcast %24 : f32 to vector<1x256xf32>
      %62 = arith.mulf %61, %60 : vector<1x256xf32>
      %63 = arith.addf %59, %62 : vector<1x256xf32>
      %c0_26 = arith.constant 0 : index
      %c17_27 = arith.constant 17 : index
      %64 = vector.load %arg5[%c0_26, %c17_27] : memref<1x384xf32, #tpu.memory_space<vmem>>, vector<1x256xf32>
      %65 = vector.broadcast %16 : f32 to vector<1x256xf32>
      %66 = arith.mulf %65, %64 : vector<1x256xf32>
      %67 = arith.addf %63, %66 : vector<1x256xf32>
      %c0_28 = arith.constant 0 : index
      %c17_29 = arith.constant 17 : index
      %68 = vector.load %arg6[%c0_28, %c17_29] : memref<1x384xf32, #tpu.memory_space<vmem>>, vector<1x256xf32>
      %69 = vector.broadcast %25 : f32 to vector<1x256xf32>
      %70 = arith.mulf %69, %68 : vector<1x256xf32>
      %71 = arith.addf %67, %70 : vector<1x256xf32>
      %c0_30 = arith.constant 0 : index
      %c18_31 = arith.constant 18 : index
      %72 = vector.load %arg5[%c0_30, %c18_31] : memref<1x384xf32, #tpu.memory_space<vmem>>, vector<1x256xf32>
      %73 = vector.broadcast %17 : f32 to vector<1x256xf32>
      %74 = arith.mulf %73, %72 : vector<1x256xf32>
      %75 = arith.addf %71, %74 : vector<1x256xf32>
      %c0_32 = arith.constant 0 : index
      %c18_33 = arith.constant 18 : index
      %76 = vector.load %arg6[%c0_32, %c18_33] : memref<1x384xf32, #tpu.memory_space<vmem>>, vector<1x256xf32>
      %77 = vector.broadcast %26 : f32 to vector<1x256xf32>
      %78 = arith.mulf %77, %76 : vector<1x256xf32>
      %79 = arith.addf %75, %78 : vector<1x256xf32>
      %c0_34 = arith.constant 0 : index
      %c32 = arith.constant 32 : index
      %80 = vector.load %arg5[%c0_34, %c32] : memref<1x384xf32, #tpu.memory_space<vmem>>, vector<1x256xf32>
      %81 = vector.broadcast %18 : f32 to vector<1x256xf32>
      %82 = arith.mulf %81, %80 : vector<1x256xf32>
      %83 = arith.addf %79, %82 : vector<1x256xf32>
      %c0_35 = arith.constant 0 : index
      %c32_36 = arith.constant 32 : index
      %84 = vector.load %arg6[%c0_35, %c32_36] : memref<1x384xf32, #tpu.memory_space<vmem>>, vector<1x256xf32>
      %85 = vector.broadcast %27 : f32 to vector<1x256xf32>
      %86 = arith.mulf %85, %84 : vector<1x256xf32>
      %87 = arith.addf %83, %86 : vector<1x256xf32>
      %c0_37 = arith.constant 0 : index
      %c33 = arith.constant 33 : index
      %88 = vector.load %arg5[%c0_37, %c33] : memref<1x384xf32, #tpu.memory_space<vmem>>, vector<1x256xf32>
      %89 = vector.broadcast %19 : f32 to vector<1x256xf32>
      %90 = arith.mulf %89, %88 : vector<1x256xf32>
      %91 = arith.addf %87, %90 : vector<1x256xf32>
      %c0_38 = arith.constant 0 : index
      %c33_39 = arith.constant 33 : index
      %92 = vector.load %arg6[%c0_38, %c33_39] : memref<1x384xf32, #tpu.memory_space<vmem>>, vector<1x256xf32>
      %93 = vector.broadcast %28 : f32 to vector<1x256xf32>
      %94 = arith.mulf %93, %92 : vector<1x256xf32>
      %95 = arith.addf %91, %94 : vector<1x256xf32>
      %c0_40 = arith.constant 0 : index
      %c34 = arith.constant 34 : index
      %96 = vector.load %arg5[%c0_40, %c34] : memref<1x384xf32, #tpu.memory_space<vmem>>, vector<1x256xf32>
      %97 = vector.broadcast %20 : f32 to vector<1x256xf32>
      %98 = arith.mulf %97, %96 : vector<1x256xf32>
      %99 = arith.addf %95, %98 : vector<1x256xf32>
      %c0_41 = arith.constant 0 : index
      %c34_42 = arith.constant 34 : index
      %100 = vector.load %arg6[%c0_41, %c34_42] : memref<1x384xf32, #tpu.memory_space<vmem>>, vector<1x256xf32>
      %101 = vector.broadcast %29 : f32 to vector<1x256xf32>
      %102 = arith.mulf %101, %100 : vector<1x256xf32>
      %103 = arith.addf %99, %102 : vector<1x256xf32>
      %104 = vector.broadcast %30 : f32 to vector<1x256xf32>
      %105 = arith.addf %103, %104 : vector<1x256xf32>
      %cst_43 = arith.constant 0.000000e+00 : f32
      %106 = vector.broadcast %cst_43 : f32 to vector<1x256xf32>
      %107 = arith.maximumf %105, %106 : vector<1x256xf32>
      %108 = arith.negf %107 : vector<1x256xf32>
      %109 = math.exp %108 : vector<1x256xf32>
      %cst_44 = arith.constant 1.000000e+00 : f32
      %110 = vector.broadcast %cst_44 : f32 to vector<1x256xf32>
      %111 = arith.addf %110, %109 : vector<1x256xf32>
      %112 = arith.divf %110, %111 : vector<1x256xf32>
      %c0_45 = arith.constant 0 : index
      %c0_46 = arith.constant 0 : index
      %c0_47 = arith.constant 0 : index
      %113 = vector.load %arg4[%c0_45, %c0_46, %c0_47] : memref<1x1x256xf32, #tpu.memory_space<vmem>>, vector<1x1x256xf32>
      %114 = vector.shape_cast %113 : vector<1x1x256xf32> to vector<1x256xf32>
      %115 = vector.shape_cast %112 : vector<1x256xf32> to vector<1x1x256xf32>
      tpu.vector_store %arg4[%c0_45, %c0_46, %c0_47], %115 {strides = array<i32>} : memref<1x1x256xf32, #tpu.memory_space<vmem>>, vector<1x1x256xf32>,
    } else {
    }
    return
  }
  func.func @transform_0(%arg0: i32, %arg1: i32) -> i32 {
    %c0_i32 = arith.constant 0 : i32
    %c0_i32_0 = arith.constant 0 : i32
    return %c0_i32 : i32
  }
  func.func @transform_1(%arg0: i32, %arg1: i32) -> (i32, i32, i32) {
    %c0_i32 = arith.constant 0 : i32
    %c0_i32_0 = arith.constant 0 : i32
    return %arg0, %arg1, %c0_i32 : i32, i32, i32
  }
  func.func @transform_2(%arg0: i32, %arg1: i32) -> (i32, i32, i32) {
    %c0_i32 = arith.constant 0 : i32
    %c0_i32_0 = arith.constant 0 : i32
    %c0_i32_1 = arith.constant 0 : i32
    return %arg0, %c0_i32, %c0_i32_0 : i32, i32, i32
  }
}

</mosaic_0001>

<bundles_post_ra>
// kernel: tpu_custom_call.1
= control target key start
LH: loop header
LB: loop body
LE: loop exit
PB: predicated region body
PF: predicated region fallthrough
CT: control target
= control target key end

     0   :  { %7 = vsyncpa [#allocation7], 0  ;;  %s1045_s0 = inlined_call_operand.hbm [shape: f32[19], index: 0, kind: input, shape index: {}]   ;;  %s1046_s1 = inlined_call_operand.hbm [shape: f32[2,4,256], index: 1, kind: input, shape index: {}]   ;;  %s1047_s2 = inlined_call_operand.hbm [shape: f32[2,1,256], index: 2, kind: output, shape index: {}]  }
   0x1   :  { %8 = vsyncpa [#allocation5], 0 }
   0x2   :  { %10 = vsyncpa [#allocation5 + $0x1], 0 }
   0x3   :  { %11 = vsyncpa [#allocation6], 0 }
   0x4   :  { %13 = vsyncpa [#allocation6 + $0x1], 0  ;;  %s883_s9 = smov 0   ;;  %s885_s10 = smov 0  }
   0x5   :  { %s887_s11 = smov 0   ;;  %s889_s12 = smov 0  }
   0x6   :  { %s891_s13 = smov 0   ;;  %s893_s14 = smov 0  }
   0x7 LB: > { %s603_s15 = sadd.s32 4294967295, %s856_s14   ;;  %s604_s16 = sadd.s32 4294967294, %s856_s14   ;;  %s856_s14 = sphi %s893_s14, %s19_s14   ;;  %s852_s13 = sphi %s891_s13, %s1061_s13   ;;  %s848_s12 = sphi %s889_s12, %s1060_s12   ;;  %s844_s11 = sphi %s887_s11, %s1059_s11   ;;  %s840_s10 = sphi %s885_s10, %s1058_s10   ;;  %s836_s9 = sphi %s883_s9, %s1057_s9  }
   0x8   : > { %p74_p0 = scmp.ne.s32.totalorder %s840_s10, %s836_s9  ;;  %p917_p1 = scmp.eq.s32.totalorder %s603_s15, 0 }
   0x9   : > { %p921_p2 = scmp.eq.s32.totalorder %s603_s15, 1  ;;  %p104_p3 = scmp.eq.s32.totalorder %s604_s16, 1 }
   0xa   : > { %p927_p4 = por %p917_p1, %p74_p0  ;;  %p605_p5 = scmp.ge.s32.totalorder %s856_s14, 1 }
   0xb   : > { %p932_p6 = por %p104_p3, %p74_p0  ;;  %p111_p7 = scmp.lt.s32.totalorder %s856_s14, 3 }
   0xc   : > { %s123_s23 = sshll.u32 %s1045_s0, 4  ;;  %s31_s25 = sadd.s32 1, %s852_s13  ;;  %s124_s23 = int_to_ptr.hbm [resolvable:$true] %s123_s23 }
   0xd   : > { %p940_p8 = pnand %p605_p5, %p111_p7  ;;  %s61_s26 = sadd.s32 1, %s844_s11 }
   0xe   : > { %p33_p12 = scmp.ge.s32.totalorder %s31_s25, 2  ;;  %s858_s27 = smov [#allocation4]  }
   0xf   : > { %p647_p10 = pneg %p940_p8  ;;  %p68_p13 = scmp.ne.s32.totalorder %s844_s11, %s840_s10 }
  0x10   : > { %s1063_s25 = smov (%p33_p12, %s31_s25), 0  ;;  %p69_p0 = scmp.eq.s32.totalorder %s856_s14, 0 }
  0x11   : > { %p648_p11 = pnand %p647_p10, %p917_p1  ;;  %s56_s28 = ssub.s32 %s852_s13, %s1063_s25 }
  0x12   : > { %p660_p3 = scmp.lt.s32.totalorder %s856_s14, 2  ;;  %p59_p5 = scmp.eq.s32.totalorder %s56_s28, 0 }
  0x13   : > { %650 = dma.hbm_to_smem (!%p648_p11), %s124_s23, 16, %s858_s27, [#allocation7]  }
  0x14   : > { %p70_p7 = por %p69_p0, %p68_p13  ;;  %p961_p9 = por %p921_p2, %p68_p13 }
  0x15   : > { %s134_s30 = sand.u32 1, %s844_s11   ;;  %s638_s5 = sshll.u32 %s852_s13, 3 }
  0x16   : > { %s967_s3 = scalar_select %p59_p5, %s844_s11, %s61_s26  }
  0x17   : > { %s608_s4 = sshll.u32 %s134_s30, 3  ;;  %s145_s8 = scalar_lea.hbm %s1046_s1, %s638_s5 }
  0x18   : > { %s138_s15 = scalar_lea.vmem [#allocation8], %s608_s4  ;;  %s147_s21 = sshll.u32 %s145_s8, 4  ;;  %s148_s21 = int_to_ptr.hbm [resolvable:$true] %s147_s21 }
  0x19   : > { %s149_s16 = sshll.u32 %s138_s15, 4  ;;  %p652_p10 = pnand %p660_p3, %p70_p7  ;;  %s150_s16 = int_to_ptr.vmem [resolvable:$true] %s149_s16 }
  0x1a   : > { %s135_s18 = scalar_lea.sflag [#allocation5], %s134_s30  ;;  %158 = sbr.rel (%p940_p8) target bundleno = 268 (0x10c), region = 28 }
  0x1b   : > { %654 = dma.hbm_to_vmem [thread:$0]  (!%p652_p10), %s148_s21, 128, %s150_s16, %s135_s18  }
  0x1f   : > { %823 = dma.done.wait (%p917_p1), [#allocation7], 16  }
  0x20   : > { %825 = vsyncadd (%p917_p1), [#allocation7], 4294967280  ;;  %s982_s22 = sand.u32 1, %s840_s10  }
  0x21   : > { %s613_s23 = sshll.u32 %s982_s22, 3  ;;  %s166_s26 = scalar_lea.sflag [#allocation5], %s982_s22 }
  0x22   : > { %s169_s27 = scalar_lea.vmem [#allocation8], %s613_s23 }
  0x23   : > { %827 = dma.done.wait (%p927_p4), %s166_s26, 128  }
  0x24   : > { %829 = vsyncadd (%p927_p4), %s166_s26, 4294967168 }
  0x25   : > { %175 = sfence }
  0x26   : > { %v192_v0 = vld [vmem:[%s169_s27] sm:$0xff]  ;;  %v243_v1 = vlaneseq  ;;  %v859_v2 = vmov 0.0   ;;  %vm199_vm1 = vcmask 1043456   ;;  %vm240_vm2 = vcmask 1040384   ;;  %s615_s17 = sld [smem:[#allocation4 + $0x1]]  ;;  %s860_s5 = smov 127  }
  0x27   : > { %194 = vst [vmem:[#allocation1] ss:$2 sm:$0xff] %v192_v0  ;;  %s616_s19 = sld [smem:[#allocation4 + $0x2]]  ;;  %s861_s6 = smov 126   ;;  %vm320_vm4 = vcmask 1039360   ;;  %vm340_vm5 = vcmask 1031168  }
  0x28   : > { %vm254_vm0 = vcmp.lt.s32.totalorder %v243_v1, 128  ;;  %vm994_vm3 = vcmp.lt.s32.totalorder %v243_v1, 256  ;;  %s617_s24 = sld [smem:[#allocation4 + $0x3]]  ;;  %s862_s15 = smov 112   ;;  %vm359_vm6 = vcmask 916480   ;;  %vm378_vm7 = vcmask 908288  }
  0x29   : > { %256 = vst.msk [vmem:[#allocation2 + $0x2] sm:$0x1] %vm254_vm0, %v859_v2  ;;  %s624_s28 = sld [smem:[#allocation4 + $0xa]]  ;;  %s863_s26 = smov 111   ;;  %vm397_vm8 = vcmask 900096   ;;  %vm416_vm9 = vcmask 785408  }
  0x2a   : > { %257 = vst.msk [vmem:[#allocation3 + $0x2] sm:$0x1] %vm254_vm0, %v859_v2  ;;  %s625_s30 = sld [smem:[#allocation4 + $0xb]]  ;;  %vm435_vm10 = vcmask 777216   ;;  %vm454_vm11 = vcmask 769024  }
  0x2b   : > { %s626_s4 = sld [smem:[#allocation4 + $0xc]] }
  0x2c   : > { %v314_v38 = vstv %s615_s17  ;;  %s618_s7 = sld [smem:[#allocation4 + $0x4]] }
  0x2d   : > { %v334_v39 = vstv %s616_s19  ;;  %s627_s8 = sld [smem:[#allocation4 + $0xd]]  ;;  %s864_s19 = smov 110  }
  0x2e   : > { %v195_v3 = vld.sshfl [vmem:[#allocation1] sm:$0xff pattern:$0x75316420]  ;;  %v196_v4 = vld.sshfl [vmem:[#allocation1 + $0x8] sm:$0xff pattern:$0x75316420]  ;;  %v353_v41 = vstv %s617_s24 }
  0x2f   : > { %v200_v5 = vsel %vm199_vm1, %v195_v3, -inf  ;;  %v207_v6 = vsel %vm199_vm1, %v196_v4, -inf  ;;  %214 = vst [vmem:[#allocation1] ss:$2 sm:$0xff] %v192_v0  ;;  %s619_s16 = sld [smem:[#allocation4 + $0x5]]  ;;  %v325_v47 = vstv %s624_s28  ;;  %s865_s28 = smov 96  }
  0x30   : > { %v201_v7 = vrot.slane %v200_v5, 4  ;;  %v208_v8 = vrot.slane %v207_v6, 4  ;;  %v344_v48 = vstv %s625_s30  ;;  %s628_s21 = sld [smem:[#allocation4 + $0xe]] }
  0x31   : > { %v363_v49 = vstv %s626_s4  ;;  %s620_s18 = sld [smem:[#allocation4 + $0x6]]  ;;  %s866_s4 = smov 95  }
  0x32   : > { %v202_v9 = vmax.f32 %v200_v5, %v201_v7  ;;  %v209_v10 = vmax.f32 %v207_v6, %v208_v8  ;;  %v372_v54 = vstv %s618_s7  ;;  %s629_s23 = sld [smem:[#allocation4 + $0xf]] }
  0x33   : > { %v382_v55 = vstv %s627_s8  ;;  %s621_s27 = sld [smem:[#allocation4 + $0x7]] }
  0x34   : > { %v203_v11 = vrot.slane %v202_v9, 2  ;;  %v210_v12 = vrot.slane %v209_v10, 2  ;;  %s630_s17 = sld [smem:[#allocation4 + $0x10]] }
  0x35   : > { %v391_v56 = vstv %s619_s16  ;;  %s622_s24 = sld [smem:[#allocation4 + $0x8]]  ;;  %s635_s16 = sshll.u32 %s848_s12, 1 }
  0x36   : > { %v204_v13 = vmax.f32 %v202_v9, %v203_v11  ;;  %v211_v14 = vmax.f32 %v209_v10, %v210_v12  ;;  %v215_v15 = vld.sshfl [vmem:[#allocation1] sm:$0xff pattern:$0x75316420]  ;;  %v216_v16 = vld.sshfl [vmem:[#allocation1 + $0x8] sm:$0xff pattern:$0x75316420]  ;;  %v401_v60 = vstv %s628_s21 }
  0x37   : > { %v219_v17 = vsel %vm199_vm1, %v215_v15, 0.0  ;;  %v226_v18 = vsel %vm199_vm1, %v216_v16, 0.0  ;;  %v410_v61 = vstv %s620_s18  ;;  %s631_s30 = sld [smem:[#allocation4 + $0x11]]  ;;  %s495_s12 = scalar_lea.sflag [#allocation6], %s982_s22 }
  0x38   : > { %v205_v19 = vrot.slane %v204_v13, 1  ;;  %v212_v20 = vrot.slane %v211_v14, 1  ;;  %v220_v21 = vrot.slane %v219_v17, 4  ;;  %v227_v22 = vrot.slane %v226_v18, 4  ;;  %s623_s7 = sld [smem:[#allocation4 + $0x9]] }
  0x39   : > { %v420_v62 = vstv %s629_s23  ;;  %v429_v2 = vstv %s621_s27  ;;  %s632_s8 = sld [smem:[#allocation4 + $0x12]]  ;;  %s505_s23 = scalar_lea.hbm %s1047_s2, %s635_s16 }
  0x3a   : > { %v206_v23 = vmax.f32 %v204_v13, %v205_v19  ;;  %v213_v24 = vmax.f32 %v211_v14, %v212_v20  ;;  %v221_v25 = vadd.f32 %v220_v21, %v219_v17  ;;  %v228_v26 = vadd.f32 %v227_v22, %v226_v18 }
  0x3b   : > { %v439_v3 = vstv %s630_s17  ;;  %v448_v4 = vstv %s622_s24  ;;  %s509_s17 = sshll.u32 %s505_s23, 4  ;;  %s510_s17 = int_to_ptr.hbm [resolvable:$true] %s509_s17 }
  0x3c   : > { %v239_v27 = vrot.slane %v213_v24, 7  ;;  %v222_v29 = vrot.slane %v221_v25, 2  ;;  %v229_v30 = vrot.slane %v228_v26, 2 }
  0x3d   : > { %v458_v8 = vstv %s631_s30 }
  0x3e   : > { %v241_v31 = vsel %vm240_vm2, %v206_v23, %v239_v27  ;;  %v223_v32 = vadd.f32 %v222_v29, %v221_v25  ;;  %v230_v33 = vadd.f32 %v229_v30, %v228_v26  ;;  %v310_v13 = vstv %s623_s7 }
  0x3f   : > { %247 = vst.msk [vmem:[#allocation2] sm:$0x3] %vm994_vm3, %v241_v31 }
  0x40   : > { %v224_v34 = vrot.slane %v223_v32, 1  ;;  %v231_v35 = vrot.slane %v230_v33, 1 }
  0x42   : > { %v225_v36 = vadd.f32 %v224_v34, %v223_v32  ;;  %v232_v37 = vadd.f32 %v231_v35, %v230_v33 }
  0x44   : > { %v250_v40 = vrot.slane %v232_v37, 7 }
  0x46   : > { %v313_v42 = vld [vmem:[#allocation2] sm:$0x7]  ;;  %v251_v43 = vsel %vm240_vm2, %v225_v36, %v250_v40 }
  0x47   : > { %v315_v44 = vmul.f32 %v314_v38, %v313_v42  ;;  %v335_v45 = vmul.f32 %v334_v39, %v313_v42  ;;  %253 = vst.msk [vmem:[#allocation3] sm:$0x3] %vm994_vm3, %v251_v43  ;;  %v354_v46 = vmul.f32 %v353_v41, %v313_v42  ;;  %v373_v57 = vmul.f32 %v372_v54, %v313_v42  ;;  %v305_v14 = vld [vmem:[#allocation2] sm:$0x3] }
  0x48   : > { %v392_v59 = vmul.f32 %v391_v56, %v313_v42  ;;  %v411_v0 = vmul.f32 %v410_v61, %v313_v42  ;;  %v430_v5 = vmul.f32 %v429_v2, %v313_v42  ;;  %v449_v7 = vmul.f32 %v448_v4, %v313_v42 }
  0x49   : > { %317 = vrot.lane.b32.xlu0 %v315_v44, %s860_s5  ;;  %337 = vrot.lane.b32.xlu1 %v335_v45, %s861_s6 }
  0x4a   : > { %356 = vrot.lane.b32.xlu2 %v354_v46, %s862_s15 }
  0x4e   : > { %v324_v50 = vld [vmem:[#allocation3] sm:$0x7] }
  0x4f   : > { %v326_v51 = vmul.f32 %v325_v47, %v324_v50  ;;  %v345_v52 = vmul.f32 %v344_v48, %v324_v50  ;;  %v364_v53 = vmul.f32 %v363_v49, %v324_v50  ;;  %v383_v58 = vmul.f32 %v382_v55, %v324_v50  ;;  %v309_v12 = vld [vmem:[#allocation3] sm:$0x3] }
  0x50   : > { %v402_v63 = vmul.f32 %v401_v60, %v324_v50  ;;  %v421_v1 = vmul.f32 %v420_v62, %v324_v50  ;;  %v440_v6 = vmul.f32 %v439_v3, %v324_v50  ;;  %v459_v9 = vmul.f32 %v458_v8, %v324_v50 }
  0x51   : > { %328 = vrot.lane.b32.xlu0 %v326_v51, %s860_s5  ;;  %347 = vrot.lane.b32.xlu1 %v345_v52, %s861_s6  ;;  %s867_s5 = smov 94   ;;  %s286_s6 = sld [smem:[#allocation4]]  ;;  %v311_v18 = vmul.f32 %v310_v13, %v309_v12 }
  0x52   : > { %366 = vrot.lane.b32.xlu2 %v364_v53, %s862_s15  ;;  %s614_s15 = sshll.u32 %s982_s22, 1 }
  0x57   : > { %v306_v11 = vstv %s286_s6 }
  0x58   : > { %v307_v19 = vmul.f32 %v306_v11, %v305_v14 }
  0x59   : > { %375 = vrot.lane.b32.xlu0 %v373_v57, %s863_s26  ;;  %385 = vrot.lane.b32.xlu1 %v383_v58, %s863_s26  ;;  %s191_s26 = scalar_lea.vmem [#allocation9], %s614_s15 }
  0x5a   : > { %394 = vrot.lane.b32.xlu2 %v392_v59, %s864_s19  ;;  %v312_v21 = vadd.f32 %v311_v18, %v307_v19  ;;  %s507_s27 = sshll.u32 %s191_s26, 4  ;;  %s508_s27 = int_to_ptr.vmem [resolvable:$true] %s507_s27 }
  0x61   : > { %404 = vrot.lane.b32.xlu0 %v402_v63, %s864_s19  ;;  %413 = vrot.lane.b32.xlu1 %v411_v0, %s865_s28  ;;  %s784_s19 = sshra.s32 %s510_s17, 4  ;;  %s785_s19 = int_to_ptr.hbm [resolvable:$true] %s784_s19 }
  0x62   : > { %423 = vrot.lane.b32.xlu2 %v421_v1, %s865_s28  ;;  %s786_s24 = scalar_lea.hbm %s785_s19, 2  ;;  %p791_p8 = scmp.lt.s32.totalorder %s785_s19, %s1047_s2 }
  0x63   : > { %p787_p1 = scmp.ne.s32.totalorder %s785_s19, %s786_s24 }
  0x65   : > { %p788_p2 = pnand %p787_p1, %p961_p9 }
  0x67   : > { %p789_p4 = pneg %p788_p2 }
  0x69   : > { %432 = vrot.lane.b32.xlu0 %v430_v5, %s866_s4  ;;  %442 = vrot.lane.b32.xlu1 %v440_v6, %s866_s4  ;;  %s790_s4 = scalar_lea.hbm %s1047_s2, 4 }
  0x6a   : > { %451 = vrot.lane.b32.xlu2 %v449_v7, %s867_s5  ;;  %p792_p11 = scmp.lt.s32.totalorder %s790_s4, %s786_s24 }
  0x6c   : > { %p793_p12 = por %p792_p11, %p791_p8 }
  0x6e   : > { %p794_p13 = pnand %p793_p12, %p789_p4 }
  0x71   : > { %461 = vrot.lane.b32.xlu0 %v459_v9, %s867_s5 }
  0xa4   : > { %v357_v10 = vpop.permute.xlu2 %356 }
  0xa5   : > { %v358_v34 = vrot.slane %v357_v10, 1 }
  0xa7   : > { %v360_v41 = vsel %vm359_vm6, %v357_v10, %v358_v34 }
  0xac   : > { %v367_v17 = vpop.permute.xlu2 %366 }
  0xad   : > { %v368_v37 = vrot.slane %v367_v17, 1 }
  0xaf   : > { %v369_v44 = vsel %vm359_vm6, %v367_v17, %v368_v37 }
  0xb4   : > { %v395_v31 = vpop.permute.xlu2 %394 }
  0xb5   : > { %v396_v48 = vrot.slane %v395_v31, 1 }
  0xb7   : > { %v398_v55 = vsel %vm397_vm8, %v395_v31, %v396_v48 }
  0xbb   : > { %v318_v15 = vpop.permute.xlu0 %317  ;;  %v338_v16 = vpop.permute.xlu1 %337 }
  0xbc   : > { %v319_v20 = vrot.slane %v318_v15, 1  ;;  %v339_v25 = vrot.slane %v338_v16, 1  ;;  %v424_v49 = vpop.permute.xlu2 %423 }
  0xbd   : > { %v425_v61 = vrot.slane %v424_v49, 1 }
  0xbe   : > { %v321_v22 = vsel %vm320_vm4, %v318_v15, %v319_v20  ;;  %v341_v33 = vsel %vm340_vm5, %v338_v16, %v339_v25  ;;  %v467_v16 = vstv %s632_s8 }
  0xbf   : > { %v323_v27 = vadd.f32 %v321_v22, %v312_v21  ;;  %v426_v0 = vsel %vm416_vm9, %v424_v49, %v425_v61 }
  0xc3   : > { %v329_v23 = vpop.permute.xlu0 %328  ;;  %v348_v24 = vpop.permute.xlu1 %347 }
  0xc4   : > { %v330_v26 = vrot.slane %v329_v23, 1  ;;  %v349_v30 = vrot.slane %v348_v24, 1  ;;  %v452_v1 = vpop.permute.xlu2 %451 }
  0xc5   : > { %v453_v9 = vrot.slane %v452_v1, 1 }
  0xc6   : > { %v331_v29 = vsel %vm320_vm4, %v329_v23, %v330_v26  ;;  %v350_v36 = vsel %vm340_vm5, %v348_v24, %v349_v30 }
  0xc7   : > { %v333_v32 = vadd.f32 %v331_v29, %v323_v27  ;;  %v455_v12 = vsel %vm454_vm11, %v452_v1, %v453_v9 }
  0xc9   : > { %v343_v35 = vadd.f32 %v341_v33, %v333_v32 }
  0xcb   : > { %v352_v38 = vadd.f32 %v350_v36, %v343_v35  ;;  %v376_v39 = vpop.permute.xlu0 %375  ;;  %v386_v40 = vpop.permute.xlu1 %385 }
  0xcc   : > { %v377_v42 = vrot.slane %v376_v39, 1  ;;  %v387_v45 = vrot.slane %v386_v40, 1 }
  0xcd   : > { %v362_v43 = vadd.f32 %v360_v41, %v352_v38 }
  0xce   : > { %v379_v47 = vsel %vm378_vm7, %v376_v39, %v377_v42  ;;  %v388_v51 = vsel %vm378_vm7, %v386_v40, %v387_v45 }
  0xcf   : > { %v371_v46 = vadd.f32 %v369_v44, %v362_v43 }
  0xd1   : > { %v381_v50 = vadd.f32 %v379_v47, %v371_v46 }
  0xd3   : > { %v390_v52 = vadd.f32 %v388_v51, %v381_v50  ;;  %v405_v53 = vpop.permute.xlu0 %404  ;;  %v414_v54 = vpop.permute.xlu1 %413 }
  0xd4   : > { %v406_v56 = vrot.slane %v405_v53, 1  ;;  %v415_v57 = vrot.slane %v414_v54, 1 }
  0xd5   : > { %v400_v58 = vadd.f32 %v398_v55, %v390_v52 }
  0xd6   : > { %v407_v59 = vsel %vm397_vm8, %v405_v53, %v406_v56  ;;  %v417_v60 = vsel %vm416_vm9, %v414_v54, %v415_v57 }
  0xd7   : > { %v409_v62 = vadd.f32 %v407_v59, %v400_v58 }
  0xd9   : > { %v419_v63 = vadd.f32 %v417_v60, %v409_v62 }
  0xdb   : > { %v433_v2 = vpop.permute.xlu0 %432  ;;  %v443_v3 = vpop.permute.xlu1 %442  ;;  %v428_v6 = vadd.f32 %v426_v0, %v419_v63 }
  0xdc   : > { %v434_v4 = vrot.slane %v433_v2, 1  ;;  %v444_v5 = vrot.slane %v443_v3, 1 }
  0xde   : > { %v436_v7 = vsel %vm435_vm10, %v433_v2, %v434_v4  ;;  %v445_v8 = vsel %vm435_vm10, %v443_v3, %v444_v5 }
  0xdf   : > { %v438_v10 = vadd.f32 %v436_v7, %v428_v6 }
  0xe1   : > { %v447_v11 = vadd.f32 %v445_v8, %v438_v10 }
  0xe3   : > { %v462_v13 = vpop.permute.xlu0 %461  ;;  %v457_v15 = vadd.f32 %v455_v12, %v447_v11 }
  0xe4   : > { %v463_v14 = vrot.slane %v462_v13, 1 }
  0xe6   : > { %v464_v17 = vsel %vm454_vm11, %v462_v13, %v463_v14 }
  0xe7   : > { %v466_v18 = vadd.f32 %v464_v17, %v457_v15 }
  0xe9   : > { %v468_v19 = vadd.f32 %v467_v16, %v466_v18 }
  0xeb   : > { %v469_v20 = vmax.f32 %v468_v19, 0.0 }
  0xed   : > { %v633_v21 = vmul.f32 -1.442695, %v469_v20 }
  0xef   : > { %721 = vpow2.f32 %v633_v21 }
  0xf5   : > { %v722_v22 = vpop.eup %721 }
  0xf6   : > { %v473_v23 = vadd.f32 1.0, %v722_v22 }
  0xf8   : > { %723 = vrcp.f32 %v473_v23  ;;  %v485_v27 = vand.u32 2147483648, %v473_v23  ;;  %v483_v30 = vand.u32 2147483647, %v473_v23  ;;  %vm479_vm13 = vweird.f32 %v473_v23 }
  0xfa   : > { %v486_v32 = vor.u32 1.1754944e-38, %v485_v27  ;;  %vm484_vm15 = vcmp.eq.f32.partialorder %v483_v30, 8.507059e+37 }
  0xfe   : > { %v724_v24 = vpop.eup %723 }
  0xff   : > { %v475_v25 = vmul.f32 %v724_v24, %v473_v23  ;;  %vm480_vm12 = vweird.f32 %v724_v24 }
 0x100   : > { %vm481_vm14 = vmor %vm479_vm13, %vm480_vm12 }
 0x101   : > { %v476_v26 = vsub.f32 1.0, %v475_v25 }
 0x103   : > { %v477_v29 = vmul.f32 %v724_v24, %v476_v26 }
 0x105   : > { %v478_v31 = vadd.f32 %v724_v24, %v477_v29 }
 0x107   : > { %v482_v33 = vsel %vm481_vm14, %v724_v24, %v478_v31 }
 0x108   : > { %v487_v34 = vsel %vm484_vm15, %v486_v32, %v482_v33 }
 0x109   : > { %493 = vst.msk [vmem:[%s191_s26] sm:$0x3] %vm994_vm3, %v487_v34 }
 0x10a   : > { %797 = shalt.err (!%p794_p13)
}
 0x10b   : > { %645 = dma.vmem_to_hbm [thread:$0]  (%p961_p9), %s508_s27, 32, %s510_s17, %s495_s12  }
 0x10c PF: > { %s521_s22 = sand.u32 1, %s836_s9   ;;  %p1056_p0 = scmp.ge.s32.totalorder %s856_s14, 2 }
 0x10d   : > { %s522_s7 = scalar_lea.sflag [#allocation6], %s521_s22 }
 0x10e   : > { %p656_p3 = pnand %p1056_p0, %p932_p6 }
 0x110   : > { %p657_p5 = pneg %p656_p3 }
 0x112   : > { %831 = dma.done.wait (%p657_p5), %s522_s7, 32  }
 0x113   : > { %833 = vsyncadd (%p657_p5), %s522_s7, 4294967264  ;;  %s19_s14 = sadd.s32 1, %s856_s14   ;;  %s1057_s9 = smov %s840_s10 }
 0x114   : > { %p16_p7 = scmp.ge.s32.totalorder %s19_s14, 4   ;;  %s1058_s10 = smov %s844_s11 }
 0x115   : > { %s1059_s11 = smov %s967_s3  ;;  %s1060_s12 = smov %s852_s13 }
 0x116   : > { %s1061_s13 = smov %s1063_s25  ;;  %18 = sbr.rel (!%p16_p7) target bundleno = 7 (0x7), region = 90 }
 0x11b   :  { %528 = vsyncpa [#allocation5], 1 }
 0x11c   :  { %530 = vsyncpa [#allocation5 + $0x1], 1 }
 0x11d   :  { %531 = vsyncpa [#allocation6], 1 }
 0x11e   :  { %533 = vsyncpa [#allocation6 + $0x1], 1 }
 0x11f   :  { %534 = vsyncpa [#allocation7], 1 }
 0x120   :  { %536 = vsyncpa [#allocation7 + $0x1], 1 }

</bundles_post_ra>
